<compile_context>
chip_gen: v7x
topology: tpu7x:2x2x1
jax: 0.10.0
libtpu: 0.0.40
codegen_flags: <defaults>
</compile_context>

<pallas_src>
import functools

import jax
import jax.numpy as jnp
from jax.experimental import pallas as pl
from jax.experimental.pallas import tpu as pltpu


def _pick_tile(n, target, align):
    """Largest divisor of n that is a multiple of `align` and <= target.
    Falls back to the full extent (always a legal full-dim block)."""
    best = None
    for t in range(align, min(n, target) + 1, align):
        if n % t == 0:
            best = t
    return best if best is not None else n


# ----------------------- Kernel A: transposed graph propagation -------------
def prop_kernel(aT_ref, xT_ref, h_ref, *, gdep, alpha):
    # aT_ref: (V, V)        transposed row-normalized adjacency (a^T)
    # xT_ref: (F_TILE, V)   transposed features, rows index (c, n, l)
    # h_ref : (gdep+1, F_TILE, V)  stacked hops h_0^T .. h_gdep^T
    aT = aT_ref[...]
    x = xT_ref[...]
    h = x
    h_ref[0] = x
    for k in range(1, gdep + 1):
        # (h @ a^T)[f, v] == sum_w a[v, w] * h[f, w]   (== nconv on this tile)
        h = alpha * x + (1.0 - alpha) * jnp.dot(
            h, aT, preferred_element_type=jnp.float32)
        h_ref[k] = h


# ----------------------- Kernel B: 1x1 conv, lane-dense output --------------
def mlp_kernel(w_ref, ho_ref, b_ref, y_ref):
    # w_ref: (c_out, cin_tot), ho_ref: (cin_tot, P_TILE), b_ref: (c_out, 1)
    # y_ref: (c_out, P_TILE)   -- large axis in lanes => unmasked stores
    y_ref[...] = (
        jnp.dot(w_ref[...], ho_ref[...], preferred_element_type=jnp.float32)
        + b_ref[...])


# ----------------------- Wrapper ---------------------------------------------
def mixprop_forward(x, adj, weight, bias, *, gdep, alpha,
                    f_tile_target=256, p_tile_target=512):
    """x: (N, C, V, L), adj: (V, V), weight: (c_out, (gdep+1)*C), bias: (c_out,)
    -> (N, c_out, V, L)."""
    N, C, V, L = x.shape
    c_out = weight.shape[0]
    K1 = gdep + 1
    cin_tot = K1 * C
    F = C * N * L          # propagation feature axis (channel-major ordering)
    P = N * L * V          # conv position axis

    x = x.astype(jnp.float32)
    adj = adj.astype(jnp.float32)
    weight = weight.astype(jnp.float32)
    bias = bias.astype(jnp.float32)

    # --- hoisted out of the kernel: row-normalized adjacency (done once) ---
    a = adj + jnp.eye(V, dtype=jnp.float32)
    a = a / jnp.sum(a, axis=1, keepdims=True)
    aT = a.T                                     # kernel A right-multiplies by a^T

    # --- glue: (N,C,V,L) -> (C,N,L,V) -> (F, V)   (single transpose over x) ---
    xT = jnp.transpose(x, (1, 0, 3, 2)).reshape(F, V)

    F_TILE = _pick_tile(F, f_tile_target, 8)
    cost_a = pl.CostEstimate(
        flops=2 * gdep * F * V * V,
        transcendentals=0,
        bytes_accessed=4 * (F * V + V * V + K1 * F * V))
    h_allT = pl.pallas_call(
        functools.partial(prop_kernel, gdep=gdep, alpha=alpha),
        out_shape=jax.ShapeDtypeStruct((K1, F, V), jnp.float32),
        grid=(F // F_TILE,),
        in_specs=[pl.BlockSpec((V, V), lambda i: (0, 0)),
                  pl.BlockSpec((F_TILE, V), lambda i: (i, 0))],
        out_specs=pl.BlockSpec((K1, F_TILE, V), lambda i: (0, i, 0)),
        compiler_params=pltpu.CompilerParams(
            dimension_semantics=("parallel",)),
        cost_estimate=cost_a,
    )(aT, xT)

    # --- glue: (K1, C, N, L, V) -> (cin_tot, P) is a PURE reshape (no transpose)
    hoT = h_allT.reshape(cin_tot, P)
    b2 = bias.reshape(c_out, 1)

    P_TILE = _pick_tile(P, p_tile_target, 128)
    cost_b = pl.CostEstimate(
        flops=2 * P * cin_tot * c_out,
        transcendentals=0,
        bytes_accessed=4 * (cin_tot * P + c_out * cin_tot + c_out + c_out * P))
    yT = pl.pallas_call(
        mlp_kernel,
        out_shape=jax.ShapeDtypeStruct((c_out, P), jnp.float32),
        grid=(P // P_TILE,),
        in_specs=[pl.BlockSpec((c_out, cin_tot), lambda j: (0, 0)),
                  pl.BlockSpec((cin_tot, P_TILE), lambda j: (0, j)),
                  pl.BlockSpec((c_out, 1), lambda j: (0, 0))],
        out_specs=pl.BlockSpec((c_out, P_TILE), lambda j: (0, j)),
        compiler_params=pltpu.CompilerParams(
            dimension_semantics=("parallel",)),
        cost_estimate=cost_b,
    )(weight, hoT, b2)

    # --- glue: (c_out, N, L, V) -> PyTorch NCHW (N, c_out, V, L) ---
    y = jnp.transpose(yT.reshape(c_out, N, L, V), (1, 0, 3, 2))
    return y


# ----------------------- Pure-JAX reference ----------------------------------
def mixprop_ref(x, adj, weight, bias, *, gdep, alpha):
    V = adj.shape[0]
    a = adj + jnp.eye(V, dtype=adj.dtype)
    d = a.sum(1)
    a = a / d[:, None]
    h = x
    out = [h]
    for _ in range(gdep):
        h = alpha * x + (1.0 - alpha) * jnp.einsum('ncwl,vw->ncvl', h, a)
        out.append(h)
    ho = jnp.concatenate(out, axis=1)
    y = jnp.einsum('ncvl,oc->novl', ho, weight) + bias[None, :, None, None]
    return y


if __name__ == "__main__":
    # Small shapes consistent with the module's forward (grid > 1 on both kernels).
    N, C, V, L = 2, 4, 8, 64       # batch, channels, nodes, sequence length
    gdep, alpha = 2, 0.05
    c_out = 8
    cin_tot = (gdep + 1) * C

    key = jax.random.PRNGKey(0)
    kx, ka, kw, kb = jax.random.split(key, 4)
    x = jax.random.normal(kx, (N, C, V, L), dtype=jnp.float32)
    adj = jax.random.uniform(ka, (V, V), dtype=jnp.float32)      # nonneg adjacency
    # Conv2d(c_in=(gdep+1)*C, c_out, kernel=(1,1)) weight: (c_out, cin, 1, 1) -> squeeze
    weight = (jax.random.normal(kw, (c_out, cin_tot), dtype=jnp.float32)
              / jnp.sqrt(jnp.float32(cin_tot)))
    bias = jax.random.normal(kb, (c_out,), dtype=jnp.float32) * 0.1

    y = mixprop_forward(x, adj, weight, bias, gdep=gdep, alpha=alpha)
    y = jax.block_until_ready(y)

    y_ref = mixprop_ref(x, adj, weight, bias, gdep=gdep, alpha=alpha)
    assert y.shape == (N, c_out, V, L), y.shape
    assert jnp.allclose(y, y_ref, atol=2e-4, rtol=2e-4), float(
        jnp.max(jnp.abs(y - y_ref)))

    print("KERNEL_OK")
</pallas_src>

<mosaic_0001>
module attributes {stable_mosaic.version = 11 : i64} {
  func.func @prop_kernel(%arg0: i32, %arg1: memref<8x8xf32, #tpu.memory_space<vmem>>, %arg2: memref<256x8xf32, #tpu.memory_space<vmem>>, %arg3: memref<3x256x8xf32, #tpu.memory_space<vmem>>) attributes {dimension_semantics = [#tpu.dimension_semantics<parallel>], iteration_bounds = array<i64: 2>, scalar_prefetch = 0 : i64, scratch_operands = 0 : i64, tpu.core_type = #tpu.core_type<tc>, window_params = [{pipeline_mode = #tpu.pipeline_mode<synchronous>, transform_indices = @transform_0, window_bounds = array<i64: 8, 8>}, {transform_indices = @transform_1, window_bounds = array<i64: 256, 8>}, {transform_indices = @transform_2, window_bounds = array<i64: 3, 256, 8>}]} {
    %c0 = arith.constant 0 : index
    %c0_0 = arith.constant 0 : index
    %0 = vector.load %arg1[%c0, %c0_0] : memref<8x8xf32, #tpu.memory_space<vmem>>, vector<8x8xf32>
    %c0_1 = arith.constant 0 : index
    %c0_2 = arith.constant 0 : index
    %1 = vector.load %arg2[%c0_1, %c0_2] : memref<256x8xf32, #tpu.memory_space<vmem>>, vector<256x8xf32>
    %c0_3 = arith.constant 0 : index
    %c0_4 = arith.constant 0 : index
    %c0_5 = arith.constant 0 : index
    %2 = vector.load %arg3[%c0_3, %c0_4, %c0_5] : memref<3x256x8xf32, #tpu.memory_space<vmem>>, vector<1x256x8xf32>
    %3 = vector.shape_cast %2 : vector<1x256x8xf32> to vector<256x8xf32>
    %4 = vector.shape_cast %1 : vector<256x8xf32> to vector<1x256x8xf32>
    tpu.vector_store %arg3[%c0_3, %c0_4, %c0_5], %4 {strides = array<i32>} : memref<3x256x8xf32, #tpu.memory_space<vmem>>, vector<1x256x8xf32>,
    %cst = arith.constant 5.000000e-02 : f32
    %5 = vector.broadcast %cst : f32 to vector<256x8xf32>
    %6 = arith.mulf %5, %1 : vector<256x8xf32>
    %cst_6 = arith.constant dense<0.000000e+00> : vector<256x8xf32>
    %7 = tpu.matmul %1, %0, %cst_6 {dimension_numbers = #tpu.dot_dimension_numbers<[1], [0], [0], [1], [0, 0, 1, 1], [], []>} : vector<256x8xf32>, vector<8x8xf32>, vector<256x8xf32> -> vector<256x8xf32>
    %cst_7 = arith.constant 0.949999988 : f32
    %8 = vector.broadcast %cst_7 : f32 to vector<256x8xf32>
    %9 = arith.mulf %8, %7 : vector<256x8xf32>
    %10 = arith.addf %6, %9 : vector<256x8xf32>
    %c1 = arith.constant 1 : index
    %c0_8 = arith.constant 0 : index
    %c0_9 = arith.constant 0 : index
    %11 = vector.load %arg3[%c1, %c0_8, %c0_9] : memref<3x256x8xf32, #tpu.memory_space<vmem>>, vector<1x256x8xf32>
    %12 = vector.shape_cast %11 : vector<1x256x8xf32> to vector<256x8xf32>
    %13 = vector.shape_cast %10 : vector<256x8xf32> to vector<1x256x8xf32>
    tpu.vector_store %arg3[%c1, %c0_8, %c0_9], %13 {strides = array<i32>} : memref<3x256x8xf32, #tpu.memory_space<vmem>>, vector<1x256x8xf32>,
    %cst_10 = arith.constant 5.000000e-02 : f32
    %14 = vector.broadcast %cst_10 : f32 to vector<256x8xf32>
    %15 = arith.mulf %14, %1 : vector<256x8xf32>
    %cst_11 = arith.constant dense<0.000000e+00> : vector<256x8xf32>
    %16 = tpu.matmul %10, %0, %cst_11 {dimension_numbers = #tpu.dot_dimension_numbers<[1], [0], [0], [1], [0, 0, 1, 1], [], []>} : vector<256x8xf32>, vector<8x8xf32>, vector<256x8xf32> -> vector<256x8xf32>
    %cst_12 = arith.constant 0.949999988 : f32
    %17 = vector.broadcast %cst_12 : f32 to vector<256x8xf32>
    %18 = arith.mulf %17, %16 : vector<256x8xf32>
    %19 = arith.addf %15, %18 : vector<256x8xf32>
    %c2 = arith.constant 2 : index
    %c0_13 = arith.constant 0 : index
    %c0_14 = arith.constant 0 : index
    %20 = vector.load %arg3[%c2, %c0_13, %c0_14] : memref<3x256x8xf32, #tpu.memory_space<vmem>>, vector<1x256x8xf32>
    %21 = vector.shape_cast %20 : vector<1x256x8xf32> to vector<256x8xf32>
    %22 = vector.shape_cast %19 : vector<256x8xf32> to vector<1x256x8xf32>
    tpu.vector_store %arg3[%c2, %c0_13, %c0_14], %22 {strides = array<i32>} : memref<3x256x8xf32, #tpu.memory_space<vmem>>, vector<1x256x8xf32>,
    return
  }
  func.func @transform_0(%arg0: i32) -> (i32, i32) {
    %c0_i32 = arith.constant 0 : i32
    %c0_i32_0 = arith.constant 0 : i32
    %c0_i32_1 = arith.constant 0 : i32
    return %c0_i32, %c0_i32_0 : i32, i32
  }
  func.func @transform_1(%arg0: i32) -> (i32, i32) {
    %c0_i32 = arith.constant 0 : i32
    %c0_i32_0 = arith.constant 0 : i32
    return %arg0, %c0_i32 : i32, i32
  }
  func.func @transform_2(%arg0: i32) -> (i32, i32, i32) {
    %c0_i32 = arith.constant 0 : i32
    %c0_i32_0 = arith.constant 0 : i32
    %c0_i32_1 = arith.constant 0 : i32
    return %c0_i32, %arg0, %c0_i32_0 : i32, i32, i32
  }
}

</mosaic_0001>

<bundles_post_ra>
// kernel: tpu_custom_call.1
= control target key start
LH: loop header
LB: loop body
LE: loop exit
PB: predicated region body
PF: predicated region fallthrough
CT: control target
= control target key end

     0   :  { %s1917_s9 = smov 0   ;;  %s1919_s10 = smov 0   ;;  %s2740_s0 = inlined_call_operand.vmem [shape: f32[8,8], index: 0, kind: input, shape index: {}]   ;;  %s2741_s1 = inlined_call_operand.vmem [shape: f32[512,8], index: 1, kind: input, shape index: {}]   ;;  %s2742_s2 = inlined_call_operand.vmem [shape: f32[3,512,8], index: 2, kind: output, shape index: {}]  }
   0x1   :  { %s1921_s11 = smov 0  }
   0x2 LB: > { %s1928_s12 = sadd.s32 4294967295, %s1900_s11   ;;  %s1930_s13 = sadd.s32 1, %s1900_s11   ;;  %s1900_s11 = sphi %s1921_s11, %s2746_s11   ;;  %s1896_s10 = sphi %s1919_s10, %s2745_s10   ;;  %s1892_s9 = sphi %s1917_s9, %s2744_s9  }
   0x3   : > { %s63_s14 = ssub.s32 %s1900_s11, %s1930_s13  ;;  %s66_s15 = sadd.s32 1, %s1896_s10 }
   0x4   : > { %p64_p0 = scmp.eq.s32.totalorder %s63_s14, 0  ;;  %p76_p1 = scmp.ne.s32.totalorder %s1896_s10, %s1892_s9 }
   0x5   : > { %p77_p2 = scmp.eq.s32.totalorder %s1928_s12, 1  ;;  %p1551_p3 = scmp.ge.s32.totalorder %s1900_s11, 1 }
   0x6   : > { %s1937_s16 = scalar_select %p64_p0, %s1896_s10, %s66_s15  }
   0x7   : > { %p1939_p4 = por %p77_p2, %p76_p1  ;;  %p113_p5 = scmp.lt.s32.totalorder %s1900_s11, 3 }
   0x9   : > { %p114_p6 = pnand %p1551_p3, %p113_p5 }
   0xa   : > { %v141_v0 = vld [vmem:[%s2740_s0] sm:$0xff] (!%p114_p6)  ;;  %s131_s20 = sand.u32 (!%p114_p6), 1, %s1892_s9   ;;  %s1552_s21 = sshll.u32 (!%p114_p6), %s1928_s12, 5  ;;  %vm174_vm0 = vcmask (!%p114_p6), 64512  }
   0xb   : > { %117 = sbr.rel (%p114_p6) target bundleno = 537 (0x219), region = 28  ;;  %1753 = vmatprep.subr.mxu0 (!%p114_p6), %v141_v0  ;;  %p135_p7 = scmp.lt.s32.totalorder (!%p114_p6), %s1552_s21, 63  ;;  %1803 = vmatprep.subr.mxu1 (!%p114_p6), %v141_v0 }
   0xc   : > { %1754 = vmatpush3.msra.mxu0 (!%p114_p6), %v141_v0  ;;  %1804 = vmatpush3.msra.mxu1 (!%p114_p6), %v141_v0  ;;  %s1853_s22 = smul.u32 (!%p114_p6), 768, %s131_s20 }
   0xe   : > { %s1961_s27 = scalar_lea.vmem (!%p114_p6), [#allocation2], %s1853_s22 }
  0x12   : > { %s2748_s21 = smov (!%p135_p7, %s1552_s21), 63  ;;  %s1686_s28 = sshll.u32 (%p1939_p4), %s1928_s12, 8 }
  0x13   : > { %s1553_s23 = sshll.u32 %s2748_s21, 3  ;;  %s2539_s3 = scalar_lea.vmem (%p1939_p4), %s2742_s2, %s1686_s28 }
  0x14   : > { %s1950_s26 = scalar_lea.vmem %s2741_s1, %s1553_s23 }
  0x15   : > { %v1953_v1 = vld [vmem:[%s1950_s26] sm:$0xff]  ;;  %v1956_v2 = vld [vmem:[%s1950_s26 + $0x8] sm:$0xff]  ;;  %v1959_v3 = vld [vmem:[%s1950_s26 + $0x10] sm:$0xff] }
  0x16   : > { %175 = vst.msk [vmem:[%s1961_s27] sm:$0xff] %vm174_vm0, %v1953_v1  ;;  %1755 = vmatprep.mubr.msk.f32.mxu0 %vm174_vm0, %v1953_v1  ;;  %176 = vst.msk [vmem:[%s1961_s27 + $0x8] sm:$0xff] %vm174_vm0, %v1956_v2  ;;  %v1975_v4 = vld [vmem:[%s1950_s26 + $0x18] sm:$0xff]  ;;  %v1978_v5 = vld [vmem:[%s1950_s26 + $0x20] sm:$0xff]  ;;  %v2211_v33 = vmul.f32 0.05, %v1956_v2 }
  0x17   : > { %177 = vst.msk [vmem:[%s1961_s27 + $0x10] sm:$0xff] %vm174_vm0, %v1959_v3  ;;  %v1981_v6 = vld [vmem:[%s1950_s26 + $0x28] sm:$0xff]  ;;  %1756 = vmatmul.mubr.msk.f32.vlgmr.msra.gmra.mrb[0].mxu0 %vm174_vm0, %v1956_v2  ;;  %178 = vst.msk [vmem:[%s1961_s27 + $0x18] sm:$0xff] %vm174_vm0, %v1975_v4  ;;  %v1995_v7 = vld [vmem:[%s1950_s26 + $0x30] sm:$0xff]  ;;  %v2214_v35 = vmul.f32 0.05, %v1953_v1 }
  0x18   : > { %179 = vst.msk [vmem:[%s1961_s27 + $0x20] sm:$0xff] %vm174_vm0, %v1978_v5  ;;  %180 = vst.msk [vmem:[%s1961_s27 + $0x28] sm:$0xff] %vm174_vm0, %v1981_v6  ;;  %v1998_v8 = vld [vmem:[%s1950_s26 + $0x38] sm:$0xff]  ;;  %v2001_v9 = vld [vmem:[%s1950_s26 + $0x40] sm:$0xff]  ;;  %1758 = vmatprep.mubr.msk.f32.mxu0 %vm174_vm0, %v1959_v3  ;;  %v2218_v40 = vmul.f32 0.05, %v1975_v4 }
  0x19   : > { %181 = vst.msk [vmem:[%s1961_s27 + $0x30] sm:$0xff] %vm174_vm0, %v1995_v7  ;;  %182 = vst.msk [vmem:[%s1961_s27 + $0x38] sm:$0xff] %vm174_vm0, %v1998_v8  ;;  %v2015_v10 = vld [vmem:[%s1950_s26 + $0x48] sm:$0xff]  ;;  %v2018_v11 = vld [vmem:[%s1950_s26 + $0x50] sm:$0xff]  ;;  %v2221_v42 = vmul.f32 0.05, %v1959_v3 }
  0x1a   : > { %183 = vst.msk [vmem:[%s1961_s27 + $0x40] sm:$0xff] %vm174_vm0, %v2001_v9  ;;  %v2021_v12 = vld [vmem:[%s1950_s26 + $0x58] sm:$0xff]  ;;  %184 = vst.msk [vmem:[%s1961_s27 + $0x48] sm:$0xff] %vm174_vm0, %v2015_v10  ;;  %v2033_v13 = vld [vmem:[%s1950_s26 + $0x60] sm:$0xff]  ;;  %v2232_v48 = vmul.f32 0.05, %v1981_v6 }
  0x1b   : > { %185 = vst.msk [vmem:[%s1961_s27 + $0x50] sm:$0xff] %vm174_vm0, %v2018_v11  ;;  %186 = vst.msk [vmem:[%s1961_s27 + $0x58] sm:$0xff] %vm174_vm0, %v2021_v12  ;;  %v2036_v14 = vld [vmem:[%s1950_s26 + $0x68] sm:$0xff]  ;;  %v2039_v15 = vld [vmem:[%s1950_s26 + $0x70] sm:$0xff]  ;;  %1759 = vmatmul.mubr.msk.f32.gmra.mrb[2].mxu0 %vm174_vm0, %v1975_v4  ;;  %v2236_v51 = vmul.f32 0.05, %v1978_v5 }
  0x1c   : > { %187 = vst.msk [vmem:[%s1961_s27 + $0x60] sm:$0xff] %vm174_vm0, %v2033_v13  ;;  %188 = vst.msk [vmem:[%s1961_s27 + $0x68] sm:$0xff] %vm174_vm0, %v2036_v14  ;;  %v2051_v16 = vld [vmem:[%s1950_s26 + $0x78] sm:$0xff]  ;;  %v2054_v17 = vld [vmem:[%s1950_s26 + $0x80] sm:$0xff]  ;;  %1761 = vmatprep.mubr.msk.f32.mxu0 %vm174_vm0, %v1978_v5  ;;  %v2246_v56 = vmul.f32 0.05, %v1998_v8 }
  0x1d   : > { %189 = vst.msk [vmem:[%s1961_s27 + $0x70] sm:$0xff] %vm174_vm0, %v2039_v15  ;;  %v2057_v18 = vld [vmem:[%s1950_s26 + $0x88] sm:$0xff]  ;;  %190 = vst.msk [vmem:[%s1961_s27 + $0x78] sm:$0xff] %vm174_vm0, %v2051_v16  ;;  %v2071_v19 = vld [vmem:[%s1950_s26 + $0x90] sm:$0xff]  ;;  %v2250_v59 = vmul.f32 0.05, %v1995_v7 }
  0x1e   : > { %191 = vst.msk [vmem:[%s1961_s27 + $0x80] sm:$0xff] %vm174_vm0, %v2054_v17  ;;  %192 = vst.msk [vmem:[%s1961_s27 + $0x88] sm:$0xff] %vm174_vm0, %v2057_v18  ;;  %v2074_v20 = vld [vmem:[%s1950_s26 + $0x98] sm:$0xff]  ;;  %v2077_v21 = vld [vmem:[%s1950_s26 + $0xa0] sm:$0xff]  ;;  %v2260_v0 = vmul.f32 0.05, %v2015_v10 }
  0x1f   : > { %193 = vst.msk [vmem:[%s1961_s27 + $0x90] sm:$0xff] %vm174_vm0, %v2071_v19  ;;  %194 = vst.msk [vmem:[%s1961_s27 + $0x98] sm:$0xff] %vm174_vm0, %v2074_v20  ;;  %v2091_v22 = vld [vmem:[%s1950_s26 + $0xa8] sm:$0xff]  ;;  %v2094_v23 = vld [vmem:[%s1950_s26 + $0xb0] sm:$0xff]  ;;  %1762 = vmatmul.mubr.msk.f32.gmra.mrb[4].mxu0 %vm174_vm0, %v1981_v6  ;;  %v2264_v3 = vmul.f32 0.05, %v2001_v9 }
  0x20   : > { %195 = vst.msk [vmem:[%s1961_s27 + $0xa0] sm:$0xff] %vm174_vm0, %v2077_v21  ;;  %v2097_v24 = vld [vmem:[%s1950_s26 + $0xb8] sm:$0xff]  ;;  %196 = vst.msk [vmem:[%s1961_s27 + $0xa8] sm:$0xff] %vm174_vm0, %v2091_v22  ;;  %v2109_v25 = vld [vmem:[%s1950_s26 + $0xc0] sm:$0xff]  ;;  %1764 = vmatprep.mubr.msk.f32.mxu0 %vm174_vm0, %v1995_v7 }
  0x21   : > { %197 = vst.msk [vmem:[%s1961_s27 + $0xb0] sm:$0xff] %vm174_vm0, %v2094_v23  ;;  %198 = vst.msk [vmem:[%s1961_s27 + $0xb8] sm:$0xff] %vm174_vm0, %v2097_v24  ;;  %v2112_v26 = vld [vmem:[%s1950_s26 + $0xc8] sm:$0xff]  ;;  %v2115_v27 = vld [vmem:[%s1950_s26 + $0xd0] sm:$0xff] }
  0x22   : > { %199 = vst.msk [vmem:[%s1961_s27 + $0xc0] sm:$0xff] %vm174_vm0, %v2109_v25  ;;  %200 = vst.msk [vmem:[%s1961_s27 + $0xc8] sm:$0xff] %vm174_vm0, %v2112_v26  ;;  %v2127_v28 = vld [vmem:[%s1950_s26 + $0xd8] sm:$0xff]  ;;  %v2130_v29 = vld [vmem:[%s1950_s26 + $0xe0] sm:$0xff] }
  0x23   : > { %201 = vst.msk [vmem:[%s1961_s27 + $0xd0] sm:$0xff] %vm174_vm0, %v2115_v27  ;;  %v2133_v30 = vld [vmem:[%s1950_s26 + $0xe8] sm:$0xff]  ;;  %202 = vst.msk [vmem:[%s1961_s27 + $0xd8] sm:$0xff] %vm174_vm0, %v2127_v28  ;;  %v2147_v31 = vld [vmem:[%s1950_s26 + $0xf0] sm:$0xff]  ;;  %1765 = vmatmul.mubr.msk.f32.gmra.mrb[6].mxu0 %vm174_vm0, %v1998_v8  ;;  %v2274_v8 = vmul.f32 0.05, %v2021_v12 }
  0x24   : > { %203 = vst.msk [vmem:[%s1961_s27 + $0xe0] sm:$0xff] %vm174_vm0, %v2130_v29  ;;  %204 = vst.msk [vmem:[%s1961_s27 + $0xe8] sm:$0xff] %vm174_vm0, %v2133_v30  ;;  %v2150_v32 = vld [vmem:[%s1950_s26 + $0xf8] sm:$0xff]  ;;  %1767 = vmatprep.mubr.msk.f32.mxu0 %vm174_vm0, %v2001_v9 }
  0x25   : > { %205 = vst.msk [vmem:[%s1961_s27 + $0xf0] sm:$0xff] %vm174_vm0, %v2147_v31  ;;  %206 = vst.msk [vmem:[%s1961_s27 + $0xf8] sm:$0xff] %vm174_vm0, %v2150_v32 }
  0x27   : > { %1768 = vmatmul.mubr.msk.f32.gmra.mrb[8].mxu0 %vm174_vm0, %v2015_v10 }
  0x28   : > { %1770 = vmatprep.mubr.msk.f32.mxu0 %vm174_vm0, %v2018_v11 }
  0x2b   : > { %1771 = vmatmul.mubr.msk.f32.gmra.mrb[10].mxu0 %vm174_vm0, %v2021_v12 }
  0x2c   : > { %1773 = vmatprep.mubr.msk.f32.mxu0 %vm174_vm0, %v2033_v13 }
  0x2f   : > { %1774 = vmatmul.mubr.msk.f32.gmra.mrb[12].mxu0 %vm174_vm0, %v2036_v14 }
  0x30   : > { %1776 = vmatprep.mubr.msk.f32.mxu0 %vm174_vm0, %v2039_v15 }
  0x33   : > { %1777 = vmatmul.mubr.msk.f32.gmra.mrb[14].mxu0 %vm174_vm0, %v2051_v16 }
  0x34   : > { %1779 = vmatprep.mubr.msk.f32.mxu0 %vm174_vm0, %v2054_v17 }
  0x37   : > { %1780 = vmatmul.mubr.msk.f32.gmra.mrb[16].mxu0 %vm174_vm0, %v2057_v18 }
  0x38   : > { %1782 = vmatprep.mubr.msk.f32.mxu0 %vm174_vm0, %v2071_v19 }
  0x3b   : > { %1783 = vmatmul.mubr.msk.f32.gmra.mrb[18].mxu0 %vm174_vm0, %v2074_v20 }
  0x3c   : > { %1785 = vmatprep.mubr.msk.f32.mxu0 %vm174_vm0, %v2077_v21 }
  0x3f   : > { %1786 = vmatmul.mubr.msk.f32.gmra.mrb[20].mxu0 %vm174_vm0, %v2091_v22 }
  0x40   : > { %1788 = vmatprep.mubr.msk.f32.mxu0 %vm174_vm0, %v2094_v23 }
  0x43   : > { %1789 = vmatmul.mubr.msk.f32.gmra.mrb[22].mxu0 %vm174_vm0, %v2097_v24 }
  0x44   : > { %1791 = vmatprep.mubr.msk.f32.mxu0 %vm174_vm0, %v2109_v25 }
  0x47   : > { %1792 = vmatmul.mubr.msk.f32.gmra.mrb[24].mxu0 %vm174_vm0, %v2112_v26 }
  0x48   : > { %1794 = vmatprep.mubr.msk.f32.mxu0 %vm174_vm0, %v2115_v27 }
  0x4b   : > { %1795 = vmatmul.mubr.msk.f32.gmra.mrb[26].mxu0 %vm174_vm0, %v2127_v28 }
  0x4c   : > { %1797 = vmatprep.mubr.msk.f32.mxu0 %vm174_vm0, %v2130_v29 }
  0x4f   : > { %1798 = vmatmul.mubr.msk.f32.gmra.mrb[28].mxu0 %vm174_vm0, %v2133_v30 }
  0x50   : > { %1800 = vmatprep.mubr.msk.f32.mxu0 %vm174_vm0, %v2147_v31 }
  0x53   : > { %1801 = vmatmul.mubr.msk.f32.gmra.mrb[30].mxu0 %vm174_vm0, %v2150_v32 }
  0xea   : > { %v1757_v34 = vpop.f32.mrb[0].mxu0 }
  0xeb   : > { %v561_v36 = vmul.f32 0.95, %v1757_v34  ;;  %v401_v37 = vpop.f32.mrb[1].mxu0  ;;  %v2278_v34 = vmul.f32 0.05, %v2018_v11 }
  0xec   : > { %v560_v38 = vmul.f32 0.95, %v401_v37 }
  0xed   : > { %v593_v39 = vadd.f32 %v561_v36, %v2211_v33 }
  0xee   : > { %v1760_v41 = vpop.f32.mrb[2].mxu0  ;;  %v592_v43 = vadd.f32 %v560_v38, %v2214_v35 }
  0xef   : > { %1587 = vst.msk [vmem:[%s1961_s27 + $0x108] sm:$0xff] %vm174_vm0, %v593_v39  ;;  %v563_v44 = vmul.f32 0.95, %v1760_v41  ;;  %v411_v45 = vpop.f32.mrb[3].mxu0 }
  0xf0   : > { %v562_v46 = vmul.f32 0.95, %v411_v45  ;;  %1586 = vst.msk [vmem:[%s1961_s27 + $0x100] sm:$0xff] %vm174_vm0, %v592_v43  ;;  %1805 = vmatprep.mubr.msk.f32.mxu1 %vm174_vm0, %v592_v43  ;;  %v2292_v43 = vmul.f32 0.05, %v2033_v13 }
  0xf1   : > { %v595_v47 = vadd.f32 %v563_v44, %v2218_v40  ;;  %1806 = vmatmul.mubr.msk.f32.vlgmr.msra.gmra.mrb[0].mxu1 %vm174_vm0, %v593_v39  ;;  %v2288_v39 = vmul.f32 0.05, %v2036_v14 }
  0xf2   : > { %v594_v49 = vadd.f32 %v562_v46, %v2221_v42  ;;  %v1763_v50 = vpop.f32.mrb[4].mxu0 }
  0xf3   : > { %1589 = vst.msk [vmem:[%s1961_s27 + $0x118] sm:$0xff] %vm174_vm0, %v595_v47  ;;  %v565_v52 = vmul.f32 0.95, %v1763_v50  ;;  %v421_v53 = vpop.f32.mrb[5].mxu0 }
  0xf4   : > { %1588 = vst.msk [vmem:[%s1961_s27 + $0x110] sm:$0xff] %vm174_vm0, %v594_v49  ;;  %v564_v54 = vmul.f32 0.95, %v421_v53  ;;  %1808 = vmatprep.mubr.msk.f32.mxu1 %vm174_vm0, %v594_v49  ;;  %v2306_v50 = vmul.f32 0.05, %v2039_v15 }
  0xf5   : > { %v597_v55 = vadd.f32 %v565_v52, %v2232_v48  ;;  %1809 = vmatmul.mubr.msk.f32.gmra.mrb[2].mxu1 %vm174_vm0, %v595_v47  ;;  %v2302_v47 = vmul.f32 0.05, %v2051_v16 }
  0xf6   : > { %v596_v57 = vadd.f32 %v564_v54, %v2236_v51  ;;  %v1766_v58 = vpop.f32.mrb[6].mxu0 }
  0xf7   : > { %1591 = vst.msk [vmem:[%s1961_s27 + $0x128] sm:$0xff] %vm174_vm0, %v597_v55  ;;  %v567_v60 = vmul.f32 0.95, %v1766_v58  ;;  %v431_v61 = vpop.f32.mrb[7].mxu0 }
  0xf8   : > { %1590 = vst.msk [vmem:[%s1961_s27 + $0x120] sm:$0xff] %vm174_vm0, %v596_v57  ;;  %v566_v62 = vmul.f32 0.95, %v431_v61  ;;  %1811 = vmatprep.mubr.msk.f32.mxu1 %vm174_vm0, %v596_v57  ;;  %v2320_v58 = vmul.f32 0.05, %v2054_v17 }
  0xf9   : > { %v599_v63 = vadd.f32 %v567_v60, %v2246_v56  ;;  %1812 = vmatmul.mubr.msk.f32.gmra.mrb[4].mxu1 %vm174_vm0, %v597_v55  ;;  %v2316_v55 = vmul.f32 0.05, %v2057_v18 }
  0xfa   : > { %v598_v1 = vadd.f32 %v566_v62, %v2250_v59  ;;  %v1769_v2 = vpop.f32.mrb[8].mxu0 }
  0xfb   : > { %1593 = vst.msk [vmem:[%s1961_s27 + $0x138] sm:$0xff] %vm174_vm0, %v599_v63  ;;  %v569_v4 = vmul.f32 0.95, %v1769_v2  ;;  %v441_v5 = vpop.f32.mrb[9].mxu0 }
  0xfc   : > { %1592 = vst.msk [vmem:[%s1961_s27 + $0x130] sm:$0xff] %vm174_vm0, %v598_v1  ;;  %v568_v6 = vmul.f32 0.95, %v441_v5  ;;  %1814 = vmatprep.mubr.msk.f32.mxu1 %vm174_vm0, %v598_v1  ;;  %v2334_v2 = vmul.f32 0.05, %v2071_v19 }
  0xfd   : > { %v601_v7 = vadd.f32 %v569_v4, %v2260_v0  ;;  %1815 = vmatmul.mubr.msk.f32.gmra.mrb[6].mxu1 %vm174_vm0, %v599_v63  ;;  %v2330_v63 = vmul.f32 0.05, %v2074_v20 }
  0xfe   : > { %v600_v9 = vadd.f32 %v568_v6, %v2264_v3  ;;  %v1772_v10 = vpop.f32.mrb[10].mxu0 }
  0xff   : > { %1595 = vst.msk [vmem:[%s1961_s27 + $0x148] sm:$0xff] %vm174_vm0, %v601_v7  ;;  %v571_v36 = vmul.f32 0.95, %v1772_v10  ;;  %v451_v37 = vpop.f32.mrb[11].mxu0 }
 0x100   : > { %1594 = vst.msk [vmem:[%s1961_s27 + $0x140] sm:$0xff] %vm174_vm0, %v600_v9  ;;  %v570_v38 = vmul.f32 0.95, %v451_v37  ;;  %1817 = vmatprep.mubr.msk.f32.mxu1 %vm174_vm0, %v600_v9  ;;  %v2348_v10 = vmul.f32 0.05, %v2077_v21 }
 0x101   : > { %v603_v12 = vadd.f32 %v571_v36, %v2274_v8  ;;  %1818 = vmatmul.mubr.msk.f32.gmra.mrb[8].mxu1 %vm174_vm0, %v601_v7  ;;  %v2344_v7 = vmul.f32 0.05, %v2091_v22 }
 0x102   : > { %v602_v11 = vadd.f32 %v570_v38, %v2278_v34  ;;  %v1775_v41 = vpop.f32.mrb[12].mxu0 }
 0x103   : > { %1597 = vst.msk [vmem:[%s1961_s27 + $0x158] sm:$0xff] %vm174_vm0, %v603_v12  ;;  %v573_v44 = vmul.f32 0.95, %v1775_v41  ;;  %v461_v45 = vpop.f32.mrb[13].mxu0 }
 0x104   : > { %1596 = vst.msk [vmem:[%s1961_s27 + $0x150] sm:$0xff] %vm174_vm0, %v602_v11  ;;  %v572_v46 = vmul.f32 0.95, %v461_v45  ;;  %1820 = vmatprep.mubr.msk.f32.mxu1 %vm174_vm0, %v602_v11  ;;  %v2362_v41 = vmul.f32 0.05, %v2094_v23 }
 0x105   : > { %v605_v14 = vadd.f32 %v573_v44, %v2288_v39  ;;  %1821 = vmatmul.mubr.msk.f32.gmra.mrb[10].mxu1 %vm174_vm0, %v603_v12  ;;  %v2358_v12 = vmul.f32 0.05, %v2097_v24 }
 0x106   : > { %v604_v13 = vadd.f32 %v572_v46, %v2292_v43  ;;  %v1778_v49 = vpop.f32.mrb[14].mxu0 }
 0x107   : > { %1599 = vst.msk [vmem:[%s1961_s27 + $0x168] sm:$0xff] %vm174_vm0, %v605_v14  ;;  %v575_v52 = vmul.f32 0.95, %v1778_v49  ;;  %v471_v53 = vpop.f32.mrb[15].mxu0 }
 0x108   : > { %1598 = vst.msk [vmem:[%s1961_s27 + $0x160] sm:$0xff] %vm174_vm0, %v604_v13  ;;  %v574_v54 = vmul.f32 0.95, %v471_v53  ;;  %1823 = vmatprep.mubr.msk.f32.mxu1 %vm174_vm0, %v604_v13  ;;  %v2376_v49 = vmul.f32 0.05, %v2109_v25 }
 0x109   : > { %v607_v16 = vadd.f32 %v575_v52, %v2302_v47  ;;  %1824 = vmatmul.mubr.msk.f32.gmra.mrb[12].mxu1 %vm174_vm0, %v605_v14  ;;  %v2372_v14 = vmul.f32 0.05, %v2112_v26 }
 0x10a   : > { %v606_v15 = vadd.f32 %v574_v54, %v2306_v50  ;;  %v1781_v57 = vpop.f32.mrb[16].mxu0 }
 0x10b   : > { %1601 = vst.msk [vmem:[%s1961_s27 + $0x178] sm:$0xff] %vm174_vm0, %v607_v16  ;;  %v577_v60 = vmul.f32 0.95, %v1781_v57  ;;  %v481_v61 = vpop.f32.mrb[17].mxu0 }
 0x10c   : > { %1600 = vst.msk [vmem:[%s1961_s27 + $0x170] sm:$0xff] %vm174_vm0, %v606_v15  ;;  %v576_v62 = vmul.f32 0.95, %v481_v61  ;;  %1826 = vmatprep.mubr.msk.f32.mxu1 %vm174_vm0, %v606_v15  ;;  %v2390_v57 = vmul.f32 0.05, %v2115_v27 }
 0x10d   : > { %v609_v18 = vadd.f32 %v577_v60, %v2316_v55  ;;  %1827 = vmatmul.mubr.msk.f32.gmra.mrb[14].mxu1 %vm174_vm0, %v607_v16  ;;  %v2386_v16 = vmul.f32 0.05, %v2127_v28 }
 0x10e   : > { %v608_v17 = vadd.f32 %v576_v62, %v2320_v58  ;;  %v1784_v1 = vpop.f32.mrb[18].mxu0 }
 0x10f   : > { %1603 = vst.msk [vmem:[%s1961_s27 + $0x188] sm:$0xff] %vm174_vm0, %v609_v18  ;;  %v579_v4 = vmul.f32 0.95, %v1784_v1  ;;  %v491_v5 = vpop.f32.mrb[19].mxu0 }
 0x110   : > { %1602 = vst.msk [vmem:[%s1961_s27 + $0x180] sm:$0xff] %vm174_vm0, %v608_v17  ;;  %v578_v6 = vmul.f32 0.95, %v491_v5  ;;  %1829 = vmatprep.mubr.msk.f32.mxu1 %vm174_vm0, %v608_v17  ;;  %v2404_v1 = vmul.f32 0.05, %v2130_v29 }
 0x111   : > { %v611_v20 = vadd.f32 %v579_v4, %v2330_v63  ;;  %1830 = vmatmul.mubr.msk.f32.gmra.mrb[16].mxu1 %vm174_vm0, %v609_v18  ;;  %v2400_v18 = vmul.f32 0.05, %v2133_v30 }
 0x112   : > { %v610_v19 = vadd.f32 %v578_v6, %v2334_v2  ;;  %v1787_v9 = vpop.f32.mrb[20].mxu0 }
 0x113   : > { %1605 = vst.msk [vmem:[%s1961_s27 + $0x198] sm:$0xff] %vm174_vm0, %v611_v20  ;;  %v581_v36 = vmul.f32 0.95, %v1787_v9  ;;  %v501_v37 = vpop.f32.mrb[21].mxu0 }
 0x114   : > { %1604 = vst.msk [vmem:[%s1961_s27 + $0x190] sm:$0xff] %vm174_vm0, %v610_v19  ;;  %v580_v38 = vmul.f32 0.95, %v501_v37  ;;  %1832 = vmatprep.mubr.msk.f32.mxu1 %vm174_vm0, %v610_v19  ;;  %v2418_v9 = vmul.f32 0.05, %v2147_v31 }
 0x115   : > { %v613_v22 = vadd.f32 %v581_v36, %v2344_v7  ;;  %1833 = vmatmul.mubr.msk.f32.gmra.mrb[18].mxu1 %vm174_vm0, %v611_v20  ;;  %v2414_v20 = vmul.f32 0.05, %v2150_v32 }
 0x116   : > { %v612_v21 = vadd.f32 %v580_v38, %v2348_v10  ;;  %v1790_v11 = vpop.f32.mrb[22].mxu0 }
 0x117   : > { %1607 = vst.msk [vmem:[%s1961_s27 + $0x1a8] sm:$0xff] %vm174_vm0, %v613_v22  ;;  %v583_v44 = vmul.f32 0.95, %v1790_v11  ;;  %v511_v45 = vpop.f32.mrb[23].mxu0 }
 0x118   : > { %1606 = vst.msk [vmem:[%s1961_s27 + $0x1a0] sm:$0xff] %vm174_vm0, %v612_v21  ;;  %v582_v46 = vmul.f32 0.95, %v511_v45  ;;  %1835 = vmatprep.mubr.msk.f32.mxu1 %vm174_vm0, %v612_v21 }
 0x119   : > { %v615_v24 = vadd.f32 %v583_v44, %v2358_v12  ;;  %1836 = vmatmul.mubr.msk.f32.gmra.mrb[20].mxu1 %vm174_vm0, %v613_v22 }
 0x11a   : > { %v614_v23 = vadd.f32 %v582_v46, %v2362_v41  ;;  %v1793_v13 = vpop.f32.mrb[24].mxu0 }
 0x11b   : > { %1609 = vst.msk [vmem:[%s1961_s27 + $0x1b8] sm:$0xff] %vm174_vm0, %v615_v24  ;;  %v585_v52 = vmul.f32 0.95, %v1793_v13  ;;  %v521_v53 = vpop.f32.mrb[25].mxu0 }
 0x11c   : > { %1608 = vst.msk [vmem:[%s1961_s27 + $0x1b0] sm:$0xff] %vm174_vm0, %v614_v23  ;;  %v584_v54 = vmul.f32 0.95, %v521_v53  ;;  %1838 = vmatprep.mubr.msk.f32.mxu1 %vm174_vm0, %v614_v23 }
 0x11d   : > { %v617_v26 = vadd.f32 %v585_v52, %v2372_v14  ;;  %1839 = vmatmul.mubr.msk.f32.gmra.mrb[22].mxu1 %vm174_vm0, %v615_v24 }
 0x11e   : > { %v616_v25 = vadd.f32 %v584_v54, %v2376_v49  ;;  %v1796_v15 = vpop.f32.mrb[26].mxu0 }
 0x11f   : > { %1611 = vst.msk [vmem:[%s1961_s27 + $0x1c8] sm:$0xff] %vm174_vm0, %v617_v26  ;;  %v587_v60 = vmul.f32 0.95, %v1796_v15  ;;  %v531_v61 = vpop.f32.mrb[27].mxu0 }
 0x120   : > { %1610 = vst.msk [vmem:[%s1961_s27 + $0x1c0] sm:$0xff] %vm174_vm0, %v616_v25  ;;  %v586_v62 = vmul.f32 0.95, %v531_v61  ;;  %1841 = vmatprep.mubr.msk.f32.mxu1 %vm174_vm0, %v616_v25 }
 0x121   : > { %v619_v28 = vadd.f32 %v587_v60, %v2386_v16  ;;  %1842 = vmatmul.mubr.msk.f32.gmra.mrb[24].mxu1 %vm174_vm0, %v617_v26 }
 0x122   : > { %v618_v27 = vadd.f32 %v586_v62, %v2390_v57  ;;  %v1799_v17 = vpop.f32.mrb[28].mxu0 }
 0x123   : > { %1613 = vst.msk [vmem:[%s1961_s27 + $0x1d8] sm:$0xff] %vm174_vm0, %v619_v28  ;;  %v589_v4 = vmul.f32 0.95, %v1799_v17  ;;  %v541_v5 = vpop.f32.mrb[29].mxu0 }
 0x124   : > { %1612 = vst.msk [vmem:[%s1961_s27 + $0x1d0] sm:$0xff] %vm174_vm0, %v618_v27  ;;  %v588_v6 = vmul.f32 0.95, %v541_v5  ;;  %1844 = vmatprep.mubr.msk.f32.mxu1 %vm174_vm0, %v618_v27 }
 0x125   : > { %v621_v30 = vadd.f32 %v589_v4, %v2400_v18  ;;  %1845 = vmatmul.mubr.msk.f32.gmra.mrb[26].mxu1 %vm174_vm0, %v619_v28 }
 0x126   : > { %v620_v29 = vadd.f32 %v588_v6, %v2404_v1  ;;  %v1802_v19 = vpop.f32.mrb[30].mxu0 }
 0x127   : > { %1615 = vst.msk [vmem:[%s1961_s27 + $0x1e8] sm:$0xff] %vm174_vm0, %v621_v30  ;;  %v591_v36 = vmul.f32 0.95, %v1802_v19  ;;  %v551_v37 = vpop.f32.mrb[31].mxu0 }
 0x128   : > { %1614 = vst.msk [vmem:[%s1961_s27 + $0x1e0] sm:$0xff] %vm174_vm0, %v620_v29  ;;  %v590_v38 = vmul.f32 0.95, %v551_v37  ;;  %1847 = vmatprep.mubr.msk.f32.mxu1 %vm174_vm0, %v620_v29 }
 0x129   : > { %v623_v22 = vadd.f32 %v591_v36, %v2414_v20  ;;  %1848 = vmatmul.mubr.msk.f32.gmra.mrb[28].mxu1 %vm174_vm0, %v621_v30 }
 0x12a   : > { %v622_v32 = vadd.f32 %v590_v38, %v2418_v9 }
 0x12b   : > { %1617 = vst.msk [vmem:[%s1961_s27 + $0x1f8] sm:$0xff] %vm174_vm0, %v623_v22 }
 0x12c   : > { %1616 = vst.msk [vmem:[%s1961_s27 + $0x1f0] sm:$0xff] %vm174_vm0, %v622_v32  ;;  %1850 = vmatprep.mubr.msk.f32.mxu1 %vm174_vm0, %v622_v32 }
 0x12d   : > { %1851 = vmatmul.mubr.msk.f32.gmra.mrb[30].mxu1 %vm174_vm0, %v623_v22 }
 0x1c4   : > { %v1807_v31 = vpop.f32.mrb[0].mxu1 }
 0x1c5   : > { %v979_v21 = vmul.f32 0.95, %v1807_v31  ;;  %v819_v11 = vpop.f32.mrb[1].mxu1 }
 0x1c6   : > { %v978_v44 = vmul.f32 0.95, %v819_v11 }
 0x1c7   : > { %v1011_v45 = vadd.f32 %v979_v21, %v2211_v33 }
 0x1c8   : > { %v1010_v46 = vadd.f32 %v978_v44, %v2214_v35  ;;  %v1810_v24 = vpop.f32.mrb[2].mxu1 }
 0x1c9   : > { %1651 = vst.msk [vmem:[%s1961_s27 + $0x208] sm:$0xff] %vm174_vm0, %v1011_v45  ;;  %v981_v23 = vmul.f32 0.95, %v1810_v24  ;;  %v829_v13 = vpop.f32.mrb[3].mxu1 }
 0x1ca   : > { %1650 = vst.msk [vmem:[%s1961_s27 + $0x200] sm:$0xff] %vm174_vm0, %v1010_v46  ;;  %v980_v52 = vmul.f32 0.95, %v829_v13 }
 0x1cb   : > { %v1013_v53 = vadd.f32 %v981_v23, %v2218_v40 }
 0x1cc   : > { %v1012_v54 = vadd.f32 %v980_v52, %v2221_v42  ;;  %v1813_v26 = vpop.f32.mrb[4].mxu1 }
 0x1cd   : > { %1653 = vst.msk [vmem:[%s1961_s27 + $0x218] sm:$0xff] %vm174_vm0, %v1013_v53  ;;  %v983_v33 = vmul.f32 0.95, %v1813_v26  ;;  %v839_v35 = vpop.f32.mrb[5].mxu1 }
 0x1ce   : > { %1652 = vst.msk [vmem:[%s1961_s27 + $0x210] sm:$0xff] %vm174_vm0, %v1012_v54  ;;  %v982_v25 = vmul.f32 0.95, %v839_v35 }
 0x1cf   : > { %v1015_v15 = vadd.f32 %v983_v33, %v2232_v48 }
 0x1d0   : > { %v1014_v60 = vadd.f32 %v982_v25, %v2236_v51  ;;  %v1816_v61 = vpop.f32.mrb[6].mxu1 }
 0x1d1   : > { %1655 = vst.msk [vmem:[%s1961_s27 + $0x228] sm:$0xff] %vm174_vm0, %v1015_v15  ;;  %v985_v40 = vmul.f32 0.95, %v1816_v61  ;;  %v849_v42 = vpop.f32.mrb[7].mxu1 }
 0x1d2   : > { %1654 = vst.msk [vmem:[%s1961_s27 + $0x220] sm:$0xff] %vm174_vm0, %v1014_v60  ;;  %v984_v62 = vmul.f32 0.95, %v849_v42 }
 0x1d3   : > { %v1017_v28 = vadd.f32 %v985_v40, %v2246_v56 }
 0x1d4   : > { %v1016_v27 = vadd.f32 %v984_v62, %v2250_v59  ;;  %v1819_v17 = vpop.f32.mrb[8].mxu1 }
 0x1d5   : > { %1657 = vst.msk [vmem:[%s1961_s27 + $0x238] sm:$0xff] %vm174_vm0, %v1017_v28  ;;  %v987_v48 = vmul.f32 0.95, %v1819_v17  ;;  %v859_v51 = vpop.f32.mrb[9].mxu1 }
 0x1d6   : > { %1656 = vst.msk [vmem:[%s1961_s27 + $0x230] sm:$0xff] %vm174_vm0, %v1016_v27  ;;  %v986_v4 = vmul.f32 0.95, %v859_v51 }
 0x1d7   : > { %v1019_v5 = vadd.f32 %v987_v48, %v2260_v0 }
 0x1d8   : > { %v1018_v6 = vadd.f32 %v986_v4, %v2264_v3  ;;  %v1822_v30 = vpop.f32.mrb[10].mxu1 }
 0x1d9   : > { %1659 = vst.msk [vmem:[%s1961_s27 + $0x248] sm:$0xff] %vm174_vm0, %v1019_v5  ;;  %v989_v56 = vmul.f32 0.95, %v1822_v30  ;;  %v869_v59 = vpop.f32.mrb[11].mxu1 }
 0x1da   : > { %1658 = vst.msk [vmem:[%s1961_s27 + $0x240] sm:$0xff] %vm174_vm0, %v1018_v6  ;;  %v988_v29 = vmul.f32 0.95, %v869_v59 }
 0x1db   : > { %v1021_v19 = vadd.f32 %v989_v56, %v2274_v8 }
 0x1dc   : > { %v1020_v36 = vadd.f32 %v988_v29, %v2278_v34  ;;  %v1825_v37 = vpop.f32.mrb[12].mxu1 }
 0x1dd   : > { %1661 = vst.msk [vmem:[%s1961_s27 + $0x258] sm:$0xff] %vm174_vm0, %v1021_v19  ;;  %v991_v0 = vmul.f32 0.95, %v1825_v37  ;;  %v879_v3 = vpop.f32.mrb[13].mxu1  ;;  %v1310_v37 = vld [vmem:[%s1961_s27 + $0x20] sm:$0xff] (%p1939_p4) }
 0x1de   : > { %1660 = vst.msk [vmem:[%s1961_s27 + $0x250] sm:$0xff] %vm174_vm0, %v1020_v36  ;;  %v990_v38 = vmul.f32 0.95, %v879_v3  ;;  %1311 = vst [vmem:[%s2539_s3 + $0x20] sm:$0xff] (%p1939_p4), %v1310_v37  ;;  %v1314_v3 = vld [vmem:[%s1961_s27 + $0x30] sm:$0xff] (%p1939_p4)  ;;  %v1438_v37 = vld [vmem:[%s1961_s27 + $0x220] sm:$0xff] (%p1939_p4) }
 0x1df   : > { %v1023_v22 = vadd.f32 %v991_v0, %v2288_v39  ;;  %v1312_v0 = vld [vmem:[%s1961_s27 + $0x28] sm:$0xff] (%p1939_p4)  ;;  %1315 = vst [vmem:[%s2539_s3 + $0x30] sm:$0xff] (%p1939_p4), %v1314_v3  ;;  %1439 = vst [vmem:[%s2539_s3 + $0x420] sm:$0xff] (%p1939_p4), %v1438_v37  ;;  %v1442_v3 = vld [vmem:[%s1961_s27 + $0x230] sm:$0xff] (%p1939_p4) }
 0x1e0   : > { %v1022_v32 = vadd.f32 %v990_v38, %v2292_v43  ;;  %v1828_v31 = vpop.f32.mrb[14].mxu1  ;;  %1313 = vst [vmem:[%s2539_s3 + $0x28] sm:$0xff] (%p1939_p4), %v1312_v0  ;;  %v1316_v38 = vld [vmem:[%s1961_s27 + $0x38] sm:$0xff] (%p1939_p4)  ;;  %v1440_v0 = vld [vmem:[%s1961_s27 + $0x228] sm:$0xff] (%p1939_p4)  ;;  %1443 = vst [vmem:[%s2539_s3 + $0x430] sm:$0xff] (%p1939_p4), %v1442_v3 }
 0x1e1   : > { %1663 = vst.msk [vmem:[%s1961_s27 + $0x268] sm:$0xff] %vm174_vm0, %v1023_v22  ;;  %v993_v8 = vmul.f32 0.95, %v1828_v31  ;;  %v889_v34 = vpop.f32.mrb[15].mxu1  ;;  %v1318_v22 = vld [vmem:[%s1961_s27 + $0x40] sm:$0xff] (%p1939_p4)  ;;  %1317 = vst [vmem:[%s2539_s3 + $0x38] sm:$0xff] (%p1939_p4), %v1316_v38 }
 0x1e2   : > { %1662 = vst.msk [vmem:[%s1961_s27 + $0x260] sm:$0xff] %vm174_vm0, %v1022_v32  ;;  %v992_v21 = vmul.f32 0.95, %v889_v34  ;;  %1319 = vst [vmem:[%s2539_s3 + $0x40] sm:$0xff] (%p1939_p4), %v1318_v22  ;;  %v1320_v32 = vld [vmem:[%s1961_s27 + $0x48] sm:$0xff] (%p1939_p4)  ;;  %v1322_v31 = vld [vmem:[%s1961_s27 + $0x50] sm:$0xff] (%p1939_p4) }
 0x1e3   : > { %v1025_v11 = vadd.f32 %v993_v8, %v2302_v47  ;;  %v1324_v8 = vld [vmem:[%s1961_s27 + $0x58] sm:$0xff] (%p1939_p4)  ;;  %1321 = vst [vmem:[%s2539_s3 + $0x48] sm:$0xff] (%p1939_p4), %v1320_v32  ;;  %1323 = vst [vmem:[%s2539_s3 + $0x50] sm:$0xff] (%p1939_p4), %v1322_v31  ;;  %v1326_v34 = vld [vmem:[%s1961_s27 + $0x60] sm:$0xff] (%p1939_p4) }
 0x1e4   : > { %v1024_v44 = vadd.f32 %v992_v21, %v2306_v50  ;;  %v1831_v45 = vpop.f32.mrb[16].mxu1  ;;  %1325 = vst [vmem:[%s2539_s3 + $0x58] sm:$0xff] (%p1939_p4), %v1324_v8  ;;  %v1328_v21 = vld [vmem:[%s1961_s27 + $0x68] sm:$0xff] (%p1939_p4)  ;;  %1327 = vst [vmem:[%s2539_s3 + $0x60] sm:$0xff] (%p1939_p4), %v1326_v34  ;;  %v1444_v38 = vld [vmem:[%s1961_s27 + $0x238] sm:$0xff] (%p1939_p4) }
 0x1e5   : > { %1665 = vst.msk [vmem:[%s1961_s27 + $0x278] sm:$0xff] %vm174_vm0, %v1025_v11  ;;  %v995_v39 = vmul.f32 0.95, %v1831_v45  ;;  %v899_v43 = vpop.f32.mrb[17].mxu1  ;;  %v1330_v11 = vld [vmem:[%s1961_s27 + $0x70] sm:$0xff] (%p1939_p4)  ;;  %1329 = vst [vmem:[%s2539_s3 + $0x68] sm:$0xff] (%p1939_p4), %v1328_v21 }
 0x1e6   : > { %1664 = vst.msk [vmem:[%s1961_s27 + $0x270] sm:$0xff] %vm174_vm0, %v1024_v44  ;;  %v994_v46 = vmul.f32 0.95, %v899_v43  ;;  %1331 = vst [vmem:[%s2539_s3 + $0x70] sm:$0xff] (%p1939_p4), %v1330_v11  ;;  %v1332_v44 = vld [vmem:[%s1961_s27 + $0x78] sm:$0xff] (%p1939_p4)  ;;  %v1334_v45 = vld [vmem:[%s1961_s27 + $0x80] sm:$0xff] (%p1939_p4) }
 0x1e7   : > { %v1027_v24 = vadd.f32 %v995_v39, %v2316_v55  ;;  %v1336_v39 = vld [vmem:[%s1961_s27 + $0x88] sm:$0xff] (%p1939_p4)  ;;  %1333 = vst [vmem:[%s2539_s3 + $0x78] sm:$0xff] (%p1939_p4), %v1332_v44  ;;  %1335 = vst [vmem:[%s2539_s3 + $0x80] sm:$0xff] (%p1939_p4), %v1334_v45  ;;  %v1338_v43 = vld [vmem:[%s1961_s27 + $0x90] sm:$0xff] (%p1939_p4) }
 0x1e8   : > { %v1026_v23 = vadd.f32 %v994_v46, %v2320_v58  ;;  %v1834_v13 = vpop.f32.mrb[18].mxu1  ;;  %1337 = vst [vmem:[%s2539_s3 + $0x88] sm:$0xff] (%p1939_p4), %v1336_v39  ;;  %v1340_v46 = vld [vmem:[%s1961_s27 + $0x98] sm:$0xff] (%p1939_p4)  ;;  %1339 = vst [vmem:[%s2539_s3 + $0x90] sm:$0xff] (%p1939_p4), %v1338_v43  ;;  %v1446_v22 = vld [vmem:[%s1961_s27 + $0x240] sm:$0xff] (%p1939_p4) }
 0x1e9   : > { %1667 = vst.msk [vmem:[%s1961_s27 + $0x288] sm:$0xff] %vm174_vm0, %v1027_v24  ;;  %v997_v47 = vmul.f32 0.95, %v1834_v13  ;;  %v909_v50 = vpop.f32.mrb[19].mxu1  ;;  %v1342_v24 = vld [vmem:[%s1961_s27 + $0xa0] sm:$0xff] (%p1939_p4)  ;;  %1341 = vst [vmem:[%s2539_s3 + $0x98] sm:$0xff] (%p1939_p4), %v1340_v46 }
 0x1ea   : > { %1666 = vst.msk [vmem:[%s1961_s27 + $0x280] sm:$0xff] %vm174_vm0, %v1026_v23  ;;  %v996_v52 = vmul.f32 0.95, %v909_v50  ;;  %1343 = vst [vmem:[%s2539_s3 + $0xa0] sm:$0xff] (%p1939_p4), %v1342_v24  ;;  %v1344_v23 = vld [vmem:[%s1961_s27 + $0xa8] sm:$0xff] (%p1939_p4)  ;;  %v1346_v13 = vld [vmem:[%s1961_s27 + $0xb0] sm:$0xff] (%p1939_p4) }
 0x1eb   : > { %v1029_v53 = vadd.f32 %v997_v47, %v2330_v63  ;;  %v1348_v47 = vld [vmem:[%s1961_s27 + $0xb8] sm:$0xff] (%p1939_p4)  ;;  %1345 = vst [vmem:[%s2539_s3 + $0xa8] sm:$0xff] (%p1939_p4), %v1344_v23  ;;  %1347 = vst [vmem:[%s2539_s3 + $0xb0] sm:$0xff] (%p1939_p4), %v1346_v13  ;;  %v1350_v50 = vld [vmem:[%s1961_s27 + $0xc0] sm:$0xff] (%p1939_p4) }
 0x1ec   : > { %v1028_v54 = vadd.f32 %v996_v52, %v2334_v2  ;;  %v1837_v26 = vpop.f32.mrb[20].mxu1  ;;  %1349 = vst [vmem:[%s2539_s3 + $0xb8] sm:$0xff] (%p1939_p4), %v1348_v47  ;;  %v1352_v52 = vld [vmem:[%s1961_s27 + $0xc8] sm:$0xff] (%p1939_p4)  ;;  %1351 = vst [vmem:[%s2539_s3 + $0xc0] sm:$0xff] (%p1939_p4), %v1350_v50  ;;  %v1450_v31 = vld [vmem:[%s1961_s27 + $0x250] sm:$0xff] (%p1939_p4) }
 0x1ed   : > { %1669 = vst.msk [vmem:[%s1961_s27 + $0x298] sm:$0xff] %vm174_vm0, %v1029_v53  ;;  %v999_v55 = vmul.f32 0.95, %v1837_v26  ;;  %v919_v58 = vpop.f32.mrb[21].mxu1  ;;  %v1354_v53 = vld [vmem:[%s1961_s27 + $0xd0] sm:$0xff] (%p1939_p4)  ;;  %1353 = vst [vmem:[%s2539_s3 + $0xc8] sm:$0xff] (%p1939_p4), %v1352_v52 }
 0x1ee   : > { %1668 = vst.msk [vmem:[%s1961_s27 + $0x290] sm:$0xff] %vm174_vm0, %v1028_v54  ;;  %v998_v33 = vmul.f32 0.95, %v919_v58  ;;  %1355 = vst [vmem:[%s2539_s3 + $0xd0] sm:$0xff] (%p1939_p4), %v1354_v53  ;;  %v1356_v54 = vld [vmem:[%s1961_s27 + $0xd8] sm:$0xff] (%p1939_p4)  ;;  %v1358_v26 = vld [vmem:[%s1961_s27 + $0xe0] sm:$0xff] (%p1939_p4) }
 0x1ef   : > { %v1031_v35 = vadd.f32 %v999_v55, %v2344_v7  ;;  %v1360_v55 = vld [vmem:[%s1961_s27 + $0xe8] sm:$0xff] (%p1939_p4)  ;;  %1357 = vst [vmem:[%s2539_s3 + $0xd8] sm:$0xff] (%p1939_p4), %v1356_v54  ;;  %1359 = vst [vmem:[%s2539_s3 + $0xe0] sm:$0xff] (%p1939_p4), %v1358_v26  ;;  %v1362_v58 = vld [vmem:[%s1961_s27 + $0xf0] sm:$0xff] (%p1939_p4) }
 0x1f0   : > { %v1030_v25 = vadd.f32 %v998_v33, %v2348_v10  ;;  %v1840_v15 = vpop.f32.mrb[22].mxu1  ;;  %1361 = vst [vmem:[%s2539_s3 + $0xe8] sm:$0xff] (%p1939_p4), %v1360_v55  ;;  %v1364_v33 = vld [vmem:[%s1961_s27 + $0xf8] sm:$0xff] (%p1939_p4)  ;;  %1363 = vst [vmem:[%s2539_s3 + $0xf0] sm:$0xff] (%p1939_p4), %v1362_v58  ;;  %v1448_v32 = vld [vmem:[%s1961_s27 + $0x248] sm:$0xff] (%p1939_p4) }
 0x1f1   : > { %1671 = vst.msk [vmem:[%s1961_s27 + $0x2a8] sm:$0xff] %vm174_vm0, %v1031_v35  ;;  %v1001_v63 = vmul.f32 0.95, %v1840_v15  ;;  %v929_v2 = vpop.f32.mrb[23].mxu1  ;;  %v1366_v35 = vld [vmem:[%s1961_s27 + $0x100] sm:$0xff] (%p1939_p4)  ;;  %1365 = vst [vmem:[%s2539_s3 + $0xf8] sm:$0xff] (%p1939_p4), %v1364_v33 }
 0x1f2   : > { %1670 = vst.msk [vmem:[%s1961_s27 + $0x2a0] sm:$0xff] %vm174_vm0, %v1030_v25  ;;  %v1000_v60 = vmul.f32 0.95, %v929_v2  ;;  %1367 = vst [vmem:[%s2539_s3 + $0x200] sm:$0xff] (%p1939_p4), %v1366_v35  ;;  %v1368_v25 = vld [vmem:[%s1961_s27 + $0x108] sm:$0xff] (%p1939_p4)  ;;  %v1370_v15 = vld [vmem:[%s1961_s27 + $0x110] sm:$0xff] (%p1939_p4) }
 0x1f3   : > { %v1033_v61 = vadd.f32 %v1001_v63, %v2358_v12  ;;  %v1372_v63 = vld [vmem:[%s1961_s27 + $0x118] sm:$0xff] (%p1939_p4)  ;;  %1369 = vst [vmem:[%s2539_s3 + $0x208] sm:$0xff] (%p1939_p4), %v1368_v25  ;;  %1371 = vst [vmem:[%s2539_s3 + $0x210] sm:$0xff] (%p1939_p4), %v1370_v15  ;;  %v1374_v2 = vld [vmem:[%s1961_s27 + $0x120] sm:$0xff] (%p1939_p4) }
 0x1f4   : > { %v1032_v40 = vadd.f32 %v1000_v60, %v2362_v41  ;;  %v1843_v42 = vpop.f32.mrb[24].mxu1  ;;  %1373 = vst [vmem:[%s2539_s3 + $0x218] sm:$0xff] (%p1939_p4), %v1372_v63  ;;  %v1376_v60 = vld [vmem:[%s1961_s27 + $0x128] sm:$0xff] (%p1939_p4)  ;;  %1375 = vst [vmem:[%s2539_s3 + $0x220] sm:$0xff] (%p1939_p4), %v1374_v2  ;;  %v1452_v8 = vld [vmem:[%s1961_s27 + $0x258] sm:$0xff] (%p1939_p4) }
 0x1f5   : > { %1673 = vst.msk [vmem:[%s1961_s27 + $0x2b8] sm:$0xff] %vm174_vm0, %v1033_v61  ;;  %v1003_v7 = vmul.f32 0.95, %v1843_v42  ;;  %v939_v10 = vpop.f32.mrb[25].mxu1  ;;  %v1378_v61 = vld [vmem:[%s1961_s27 + $0x130] sm:$0xff] (%p1939_p4)  ;;  %1377 = vst [vmem:[%s2539_s3 + $0x228] sm:$0xff] (%p1939_p4), %v1376_v60 }
 0x1f6   : > { %1672 = vst.msk [vmem:[%s1961_s27 + $0x2b0] sm:$0xff] %vm174_vm0, %v1032_v40  ;;  %v1002_v62 = vmul.f32 0.95, %v939_v10  ;;  %1379 = vst [vmem:[%s2539_s3 + $0x230] sm:$0xff] (%p1939_p4), %v1378_v61  ;;  %v1380_v40 = vld [vmem:[%s1961_s27 + $0x138] sm:$0xff] (%p1939_p4)  ;;  %v1382_v42 = vld [vmem:[%s1961_s27 + $0x140] sm:$0xff] (%p1939_p4) }
 0x1f7   : > { %v1035_v28 = vadd.f32 %v1003_v7, %v2372_v14  ;;  %v1384_v7 = vld [vmem:[%s1961_s27 + $0x148] sm:$0xff] (%p1939_p4)  ;;  %1381 = vst [vmem:[%s2539_s3 + $0x238] sm:$0xff] (%p1939_p4), %v1380_v40  ;;  %1383 = vst [vmem:[%s2539_s3 + $0x240] sm:$0xff] (%p1939_p4), %v1382_v42  ;;  %v1386_v10 = vld [vmem:[%s1961_s27 + $0x150] sm:$0xff] (%p1939_p4) }
 0x1f8   : > { %v1034_v27 = vadd.f32 %v1002_v62, %v2376_v49  ;;  %v1846_v17 = vpop.f32.mrb[26].mxu1  ;;  %1385 = vst [vmem:[%s2539_s3 + $0x248] sm:$0xff] (%p1939_p4), %v1384_v7  ;;  %v1388_v62 = vld [vmem:[%s1961_s27 + $0x158] sm:$0xff] (%p1939_p4)  ;;  %1387 = vst [vmem:[%s2539_s3 + $0x250] sm:$0xff] (%p1939_p4), %v1386_v10  ;;  %v1454_v34 = vld [vmem:[%s1961_s27 + $0x260] sm:$0xff] (%p1939_p4) }
 0x1f9   : > { %1675 = vst.msk [vmem:[%s1961_s27 + $0x2c8] sm:$0xff] %vm174_vm0, %v1035_v28  ;;  %v1005_v12 = vmul.f32 0.95, %v1846_v17  ;;  %v949_v41 = vpop.f32.mrb[27].mxu1  ;;  %v1390_v28 = vld [vmem:[%s1961_s27 + $0x160] sm:$0xff] (%p1939_p4)  ;;  %1389 = vst [vmem:[%s2539_s3 + $0x258] sm:$0xff] (%p1939_p4), %v1388_v62 }
 0x1fa   : > { %1674 = vst.msk [vmem:[%s1961_s27 + $0x2c0] sm:$0xff] %vm174_vm0, %v1034_v27  ;;  %v1004_v48 = vmul.f32 0.95, %v949_v41  ;;  %1391 = vst [vmem:[%s2539_s3 + $0x260] sm:$0xff] (%p1939_p4), %v1390_v28  ;;  %v1392_v27 = vld [vmem:[%s1961_s27 + $0x168] sm:$0xff] (%p1939_p4)  ;;  %v1394_v17 = vld [vmem:[%s1961_s27 + $0x170] sm:$0xff] (%p1939_p4) }
 0x1fb   : > { %v1037_v51 = vadd.f32 %v1005_v12, %v2386_v16  ;;  %v1396_v12 = vld [vmem:[%s1961_s27 + $0x178] sm:$0xff] (%p1939_p4)  ;;  %1393 = vst [vmem:[%s2539_s3 + $0x268] sm:$0xff] (%p1939_p4), %v1392_v27  ;;  %1395 = vst [vmem:[%s2539_s3 + $0x270] sm:$0xff] (%p1939_p4), %v1394_v17  ;;  %v1398_v41 = vld [vmem:[%s1961_s27 + $0x180] sm:$0xff] (%p1939_p4) }
 0x1fc   : > { %v1036_v4 = vadd.f32 %v1004_v48, %v2390_v57  ;;  %v1849_v5 = vpop.f32.mrb[28].mxu1  ;;  %1397 = vst [vmem:[%s2539_s3 + $0x278] sm:$0xff] (%p1939_p4), %v1396_v12  ;;  %v1400_v48 = vld [vmem:[%s1961_s27 + $0x188] sm:$0xff] (%p1939_p4)  ;;  %1399 = vst [vmem:[%s2539_s3 + $0x280] sm:$0xff] (%p1939_p4), %v1398_v41  ;;  %v1458_v11 = vld [vmem:[%s1961_s27 + $0x270] sm:$0xff] (%p1939_p4) }
 0x1fd   : > { %1677 = vst.msk [vmem:[%s1961_s27 + $0x2d8] sm:$0xff] %vm174_vm0, %v1037_v51  ;;  %v1007_v14 = vmul.f32 0.95, %v1849_v5  ;;  %v959_v49 = vpop.f32.mrb[29].mxu1  ;;  %v1402_v51 = vld [vmem:[%s1961_s27 + $0x190] sm:$0xff] (%p1939_p4)  ;;  %1401 = vst [vmem:[%s2539_s3 + $0x288] sm:$0xff] (%p1939_p4), %v1400_v48 }
 0x1fe   : > { %1676 = vst.msk [vmem:[%s1961_s27 + $0x2d0] sm:$0xff] %vm174_vm0, %v1036_v4  ;;  %v1006_v6 = vmul.f32 0.95, %v959_v49  ;;  %1403 = vst [vmem:[%s2539_s3 + $0x290] sm:$0xff] (%p1939_p4), %v1402_v51  ;;  %v1404_v4 = vld [vmem:[%s1961_s27 + $0x198] sm:$0xff] (%p1939_p4)  ;;  %v1406_v5 = vld [vmem:[%s1961_s27 + $0x1a0] sm:$0xff] (%p1939_p4) }
 0x1ff   : > { %v1039_v30 = vadd.f32 %v1007_v14, %v2400_v18  ;;  %v1302_v18 = vld [vmem:[%s1961_s27] sm:$0xff] (%p1939_p4)  ;;  %v1408_v14 = vld [vmem:[%s1961_s27 + $0x1a8] sm:$0xff] (%p1939_p4)  ;;  %1405 = vst [vmem:[%s2539_s3 + $0x298] sm:$0xff] (%p1939_p4), %v1404_v4  ;;  %1407 = vst [vmem:[%s2539_s3 + $0x2a0] sm:$0xff] (%p1939_p4), %v1406_v5 }
 0x200   : > { %v1038_v56 = vadd.f32 %v1006_v6, %v2404_v1  ;;  %v1852_v59 = vpop.f32.mrb[30].mxu1  ;;  %1081 = sbr.rel (!%p1939_p4) target bundleno = 537 (0x219), region = 32  ;;  %v1304_v1 = vld [vmem:[%s1961_s27 + $0x8] sm:$0xff] (%p1939_p4)  ;;  %1303 = vst [vmem:[%s2539_s3] sm:$0xff] (%p1939_p4), %v1302_v18  ;;  %1409 = vst [vmem:[%s2539_s3 + $0x2a8] sm:$0xff] (%p1939_p4), %v1408_v14  ;;  %v1410_v49 = vld [vmem:[%s1961_s27 + $0x1b0] sm:$0xff] (%p1939_p4) }
 0x201   : > { %1679 = vst.msk [vmem:[%s1961_s27 + $0x2e8] sm:$0xff] %vm174_vm0, %v1039_v30  ;;  %v1009_v16 = vmul.f32 0.95, %v1852_v59  ;;  %v969_v29 = vpop.f32.mrb[31].mxu1  ;;  %1305 = vst [vmem:[%s2539_s3 + $0x8] sm:$0xff] (%p1939_p4), %v1304_v1  ;;  %v1412_v6 = vld [vmem:[%s1961_s27 + $0x1b8] sm:$0xff] (%p1939_p4) }
 0x202   : > { %1678 = vst.msk [vmem:[%s1961_s27 + $0x2e0] sm:$0xff] %vm174_vm0, %v1038_v56  ;;  %v1008_v57 = vmul.f32 0.95, %v969_v29  ;;  %v1414_v30 = vld [vmem:[%s1961_s27 + $0x1c0] sm:$0xff] (%p1939_p4)  ;;  %1411 = vst [vmem:[%s2539_s3 + $0x2b0] sm:$0xff] (%p1939_p4), %v1410_v49  ;;  %v1416_v56 = vld [vmem:[%s1961_s27 + $0x1c8] sm:$0xff] (%p1939_p4) }
 0x203   : > { %v1041_v19 = vadd.f32 %v1009_v16, %v2414_v20  ;;  %v1306_v20 = vld [vmem:[%s1961_s27 + $0x10] sm:$0xff] (%p1939_p4)  ;;  %1413 = vst [vmem:[%s2539_s3 + $0x2b8] sm:$0xff] (%p1939_p4), %v1412_v6  ;;  %1415 = vst [vmem:[%s2539_s3 + $0x2c0] sm:$0xff] (%p1939_p4), %v1414_v30  ;;  %v1420_v16 = vld [vmem:[%s1961_s27 + $0x1d8] sm:$0xff] (%p1939_p4) }
 0x204   : > { %v1040_v36 = vadd.f32 %v1008_v57, %v2418_v9  ;;  %v1308_v9 = vld [vmem:[%s1961_s27 + $0x18] sm:$0xff] (%p1939_p4)  ;;  %1307 = vst [vmem:[%s2539_s3 + $0x10] sm:$0xff] (%p1939_p4), %v1306_v20  ;;  %v1418_v59 = vld [vmem:[%s1961_s27 + $0x1d0] sm:$0xff] (%p1939_p4)  ;;  %1417 = vst [vmem:[%s2539_s3 + $0x2c8] sm:$0xff] (%p1939_p4), %v1416_v56 }
 0x205   : > { %1681 = vst.msk [vmem:[%s1961_s27 + $0x2f8] sm:$0xff] %vm174_vm0, %v1041_v19  ;;  %1309 = vst [vmem:[%s2539_s3 + $0x18] sm:$0xff] (%p1939_p4), %v1308_v9  ;;  %v1422_v29 = vld [vmem:[%s1961_s27 + $0x1e0] sm:$0xff] (%p1939_p4)  ;;  %v1424_v57 = vld [vmem:[%s1961_s27 + $0x1e8] sm:$0xff] (%p1939_p4) }
 0x206   : > { %1680 = vst.msk [vmem:[%s1961_s27 + $0x2f0] sm:$0xff] %vm174_vm0, %v1040_v36  ;;  %1419 = vst [vmem:[%s2539_s3 + $0x2d0] sm:$0xff] (%p1939_p4), %v1418_v59  ;;  %v1426_v19 = vld [vmem:[%s1961_s27 + $0x1f0] sm:$0xff] (%p1939_p4)  ;;  %v1428_v36 = vld [vmem:[%s1961_s27 + $0x1f8] sm:$0xff] (%p1939_p4) }
 0x207   : > { %1421 = vst [vmem:[%s2539_s3 + $0x2d8] sm:$0xff] %v1420_v16  ;;  %1423 = vst [vmem:[%s2539_s3 + $0x2e0] sm:$0xff] %v1422_v29  ;;  %v1430_v18 = vld [vmem:[%s1961_s27 + $0x200] sm:$0xff]  ;;  %v1432_v1 = vld [vmem:[%s1961_s27 + $0x208] sm:$0xff] }
 0x208   : > { %1425 = vst [vmem:[%s2539_s3 + $0x2e8] sm:$0xff] %v1424_v57  ;;  %1427 = vst [vmem:[%s2539_s3 + $0x2f0] sm:$0xff] %v1426_v19  ;;  %v1434_v20 = vld [vmem:[%s1961_s27 + $0x210] sm:$0xff]  ;;  %v1436_v9 = vld [vmem:[%s1961_s27 + $0x218] sm:$0xff] }
 0x209   : > { %1429 = vst [vmem:[%s2539_s3 + $0x2f8] sm:$0xff] %v1428_v36  ;;  %1431 = vst [vmem:[%s2539_s3 + $0x400] sm:$0xff] %v1430_v18  ;;  %v1456_v21 = vld [vmem:[%s1961_s27 + $0x268] sm:$0xff]  ;;  %v1460_v44 = vld [vmem:[%s1961_s27 + $0x278] sm:$0xff] }
 0x20a   : > { %1433 = vst [vmem:[%s2539_s3 + $0x408] sm:$0xff] %v1432_v1  ;;  %1435 = vst [vmem:[%s2539_s3 + $0x410] sm:$0xff] %v1434_v20  ;;  %v1462_v45 = vld [vmem:[%s1961_s27 + $0x280] sm:$0xff]  ;;  %v1464_v39 = vld [vmem:[%s1961_s27 + $0x288] sm:$0xff] }
 0x20b   : > { %1437 = vst [vmem:[%s2539_s3 + $0x418] sm:$0xff] %v1436_v9  ;;  %1441 = vst [vmem:[%s2539_s3 + $0x428] sm:$0xff] %v1440_v0  ;;  %v1466_v43 = vld [vmem:[%s1961_s27 + $0x290] sm:$0xff]  ;;  %v1468_v46 = vld [vmem:[%s1961_s27 + $0x298] sm:$0xff] }
 0x20c   : > { %1445 = vst [vmem:[%s2539_s3 + $0x438] sm:$0xff] %v1444_v38  ;;  %1447 = vst [vmem:[%s2539_s3 + $0x440] sm:$0xff] %v1446_v22  ;;  %v1470_v24 = vld [vmem:[%s1961_s27 + $0x2a0] sm:$0xff]  ;;  %v1472_v23 = vld [vmem:[%s1961_s27 + $0x2a8] sm:$0xff] }
 0x20d   : > { %1449 = vst [vmem:[%s2539_s3 + $0x448] sm:$0xff] %v1448_v32  ;;  %1451 = vst [vmem:[%s2539_s3 + $0x450] sm:$0xff] %v1450_v31  ;;  %v1474_v13 = vld [vmem:[%s1961_s27 + $0x2b0] sm:$0xff]  ;;  %v1476_v47 = vld [vmem:[%s1961_s27 + $0x2b8] sm:$0xff] }
 0x20e   : > { %1453 = vst [vmem:[%s2539_s3 + $0x458] sm:$0xff] %v1452_v8  ;;  %1455 = vst [vmem:[%s2539_s3 + $0x460] sm:$0xff] %v1454_v34  ;;  %v1478_v50 = vld [vmem:[%s1961_s27 + $0x2c0] sm:$0xff]  ;;  %v1480_v52 = vld [vmem:[%s1961_s27 + $0x2c8] sm:$0xff] }
 0x20f   : > { %1457 = vst [vmem:[%s2539_s3 + $0x468] sm:$0xff] %v1456_v21  ;;  %1459 = vst [vmem:[%s2539_s3 + $0x470] sm:$0xff] %v1458_v11  ;;  %v1482_v53 = vld [vmem:[%s1961_s27 + $0x2d0] sm:$0xff]  ;;  %v1484_v54 = vld [vmem:[%s1961_s27 + $0x2d8] sm:$0xff] }
 0x210   : > { %1461 = vst [vmem:[%s2539_s3 + $0x478] sm:$0xff] %v1460_v44  ;;  %1463 = vst [vmem:[%s2539_s3 + $0x480] sm:$0xff] %v1462_v45  ;;  %v1486_v26 = vld [vmem:[%s1961_s27 + $0x2e0] sm:$0xff]  ;;  %v1488_v55 = vld [vmem:[%s1961_s27 + $0x2e8] sm:$0xff] }
 0x211   : > { %1465 = vst [vmem:[%s2539_s3 + $0x488] sm:$0xff] %v1464_v39  ;;  %1467 = vst [vmem:[%s2539_s3 + $0x490] sm:$0xff] %v1466_v43  ;;  %v1490_v58 = vld [vmem:[%s1961_s27 + $0x2f0] sm:$0xff]  ;;  %v1492_v33 = vld [vmem:[%s1961_s27 + $0x2f8] sm:$0xff] }
 0x212   : > { %1469 = vst [vmem:[%s2539_s3 + $0x498] sm:$0xff] %v1468_v46  ;;  %1471 = vst [vmem:[%s2539_s3 + $0x4a0] sm:$0xff] %v1470_v24 }
 0x213   : > { %1473 = vst [vmem:[%s2539_s3 + $0x4a8] sm:$0xff] %v1472_v23  ;;  %1475 = vst [vmem:[%s2539_s3 + $0x4b0] sm:$0xff] %v1474_v13 }
 0x214   : > { %1477 = vst [vmem:[%s2539_s3 + $0x4b8] sm:$0xff] %v1476_v47  ;;  %1479 = vst [vmem:[%s2539_s3 + $0x4c0] sm:$0xff] %v1478_v50 }
 0x215   : > { %1481 = vst [vmem:[%s2539_s3 + $0x4c8] sm:$0xff] %v1480_v52  ;;  %1483 = vst [vmem:[%s2539_s3 + $0x4d0] sm:$0xff] %v1482_v53 }
 0x216   : > { %1485 = vst [vmem:[%s2539_s3 + $0x4d8] sm:$0xff] %v1484_v54  ;;  %1487 = vst [vmem:[%s2539_s3 + $0x4e0] sm:$0xff] %v1486_v26 }
 0x217   : > { %1489 = vst [vmem:[%s2539_s3 + $0x4e8] sm:$0xff] %v1488_v55  ;;  %1491 = vst [vmem:[%s2539_s3 + $0x4f0] sm:$0xff] %v1490_v58 }
 0x218   : > { %1493 = vst [vmem:[%s2539_s3 + $0x4f8] sm:$0xff] %v1492_v33 }
 0x219 PF: > { %p9_p8 = scmp.ge.s32.totalorder %s1930_s13, 4   ;;  %s2744_s9 = smov %s1896_s10 }
 0x21a   : > { %s2745_s10 = smov %s1937_s16  ;;  %s2746_s11 = smov %s1930_s13 }
 0x21b   :  { %11 = sbr.rel (!%p9_p8) target bundleno = 2 (0x2), region = 98 }

</bundles_post_ra>
